<compile_context>
chip_gen: v6e
topology: v6e:2x2x1
jax: 0.10.0
libtpu: 0.0.40
codegen_flags: <defaults>
</compile_context>

<pallas_src>
import functools
import itertools

import jax
import jax.numpy as jnp
import numpy as np
from jax.experimental import pallas as pl
from jax.experimental.pallas import tpu as pltpu


# -----------------------------------------------------------------------------
# Octahedral group machinery (parameter-side glue, plain JAX)
# -----------------------------------------------------------------------------
# TODO(synk): the original `octahedral_transform` helper is not part of the given
# source; we use a deterministic signed-axis-permutation enumeration (24 proper
# rotations, 48 with reflections).  The element *ordering* may differ from the
# original helper, but the generated filter bank spans the same group orbit.
def octahedral_elements(reflection: bool):
    elems = []
    for perm in itertools.permutations((0, 1, 2)):
        sgn = 1
        p = list(perm)
        for i in range(3):
            for j in range(i + 1, 3):
                if p[i] > p[j]:
                    sgn = -sgn
        for signs in itertools.product((1, -1), repeat=3):
            det = sgn * signs[0] * signs[1] * signs[2]
            if reflection or det == 1:
                elems.append((perm, signs))
    return elems


def apply_octahedral(w, perm, signs):
    """Apply a signed axis permutation to the last 3 (spatial) dims of w."""
    base = w.ndim - 3
    w = jnp.transpose(w, tuple(range(base)) + tuple(base + p for p in perm))
    flip_axes = tuple(base + i for i in range(3) if signs[i] < 0)
    if flip_axes:
        w = jnp.flip(w, axis=flip_axes)
    return w


def generate_filter_bank(weight, group_elems):
    nfb, oc, ic, k = weight.shape[0], weight.shape[1], weight.shape[2], weight.shape[3]
    w = weight.reshape(nfb * oc, ic, k, k, k)
    bank = jnp.stack([apply_octahedral(w, p, s) for (p, s) in group_elems], axis=0)
    bank = jnp.swapaxes(bank, 0, 1)                       # (nfb*oc, G, ic, k, k, k)
    return bank.reshape(nfb, oc, len(group_elems), ic, k, k, k)


def build_relaxed_conv_weights(weight, relaxed_weights, reflection):
    """Mirrors: einsum('na, noa... -> oa...', relaxed, filter_bank).reshape(oc*G, ic, k, k, k)."""
    group_elems = octahedral_elements(reflection)
    fb = generate_filter_bank(weight, group_elems)        # (nfb, oc, G, ic, k, k, k)
    rcw = jnp.einsum('na,noaixyz->oaixyz', relaxed_weights, fb)   # (oc, G, ic, k, k, k)
    oc, G, ic, k = rcw.shape[0], rcw.shape[1], rcw.shape[2], rcw.shape[3]
    return rcw.reshape(oc * G, ic, k, k, k)               # (Cout, Cin, k, k, k)


# -----------------------------------------------------------------------------
# Pallas kernel: per output depth plane, close the whole k^3-tap reduction with
# k fat-K MXU GEMMs (bf16 inputs, f32 accumulation) and fuse leaky_relu.
# -----------------------------------------------------------------------------
def _lift_conv_kernel(*refs, k, activation):
    # refs[:k]   : k depth-shifted im2col blocks, each (H*W, k^2*Cin)  bf16
    # refs[k]    : weights (k, k^2*Cin, Cout)                          bf16
    # refs[k+1]  : output (H*W, Cout)                                  f32
    x_refs = refs[:k]
    w_ref = refs[k]
    o_ref = refs[k + 1]

    acc = jnp.dot(x_refs[0][...], w_ref[0], preferred_element_type=jnp.float32)
    for kd in range(1, k):
        acc = acc + jnp.dot(x_refs[kd][...], w_ref[kd],
                            preferred_element_type=jnp.float32)
    if activation:
        acc = jnp.where(acc >= 0, acc, 0.01 * acc)        # F.leaky_relu, slope 0.01
    o_ref[...] = acc


def conv3d_pallas(x, conv_w, *, activation):
    """x: (B, Cin, D, H, W) f32; conv_w: (Cout, Cin, k, k, k) f32.
    Returns (B, Cout, D, H, W) = F.conv3d(x, conv_w, padding=(k-1)//2) [+ leaky_relu].
    MXU math runs in bf16 with f32 accumulation."""
    B, Cin, D, H, W = x.shape
    Cout, _, k = conv_w.shape[0], conv_w.shape[1], conv_w.shape[2]
    assert k % 2 == 1, "padding=(k-1)//2 only matches PyTorch 'same' size for odd k"
    p = (k - 1) // 2
    HW = H * W
    KC2 = k * k * Cin      # fat-K contraction dim of each per-depth-tap GEMM

    # ---- weights: (Cout, Cin, kd, kh, kw) -> (kd, kh, kw, Cin, Cout) -> (k, KC2, Cout)
    w3 = jnp.transpose(conv_w, (2, 3, 4, 1, 0)).reshape(k, KC2, Cout).astype(jnp.bfloat16)

    # ---- input: channels-last bf16, pad H/W, in-plane (kh, kw) im2col only (k^2 blow-up,
    # not k^3), then zero-pad the depth axis so depth taps are pure index shifts.
    xt = jnp.transpose(x, (0, 2, 3, 4, 1)).astype(jnp.bfloat16)     # (B, D, H, W, Cin)
    xhw = jnp.pad(xt, ((0, 0), (0, 0), (p, p), (p, p), (0, 0)))     # (B, D, H+2p, W+2p, Cin)
    taps = [xhw[:, :, kh:kh + H, kw:kw + W, :]
            for kh in range(k) for kw in range(k)]
    x2 = jnp.concatenate(taps, axis=-1).reshape(B, D, HW, KC2)      # (B, D, H*W, KC2)
    x2 = jnp.pad(x2, ((0, 0), (p, p), (0, 0), (0, 0)))              # (B, D+2p, H*W, KC2)

    # k depth-shifted views of the *same* HBM array: view kd covers input depth d+kd.
    in_specs = [pl.BlockSpec((None, None, HW, KC2),
                             lambda b, d, kd=kd: (b, d + kd, 0, 0))
                for kd in range(k)]
    in_specs.append(pl.BlockSpec((k, KC2, Cout), lambda b, d: (0, 0, 0)))

    # TODO(synk): for very large H*W / Cout, add a third grid axis tiling the
    # (H*W, Cout) output plane to bound per-step VMEM.
    kernel = functools.partial(_lift_conv_kernel, k=k, activation=activation)
    out = pl.pallas_call(
        kernel,
        out_shape=jax.ShapeDtypeStruct((B, D, HW, Cout), jnp.float32),
        grid=(B, D),
        in_specs=in_specs,
        out_specs=pl.BlockSpec((None, None, HW, Cout), lambda b, d: (b, d, 0, 0)),
        compiler_params=pltpu.CompilerParams(
            dimension_semantics=("parallel", "parallel")),
    )(*([x2] * k), w3)

    y = out.reshape(B, D, H, W, Cout)
    return jnp.transpose(y, (0, 4, 1, 2, 3))                        # (B, Cout, D, H, W)


def sep_relaxed_octahedral_lift_conv3d(x, weight, relaxed_weights, *,
                                       reflection, activation=True):
    """Full forward pass.  x: (B, Cin, D, H, W).  Returns (B, oc, G, D, H, W)."""
    conv_w = build_relaxed_conv_weights(weight, relaxed_weights, reflection)
    oc = weight.shape[1]
    G = conv_w.shape[0] // oc
    y = conv3d_pallas(x, conv_w, activation=activation)             # (B, oc*G, D, H, W)
    B, _, D, H, W = y.shape
    return y.reshape(B, oc, G, D, H, W)


# -----------------------------------------------------------------------------
# Demo / self-check
# -----------------------------------------------------------------------------
if __name__ == "__main__":
    B, Cin, D, H, W = 2, 2, 8, 8, 8
    out_channels, kernel_size, num_filter_basis = 2, 3, 2
    reflection = False
    group_order = 48 if reflection else 24

    key = jax.random.PRNGKey(0)
    kx, kw = jax.random.split(key)
    x = jax.random.normal(kx, (B, Cin, D, H, W), dtype=jnp.float32)

    # deterministic kaiming-uniform-style init of the basis weights
    fan_in = out_channels * Cin * kernel_size ** 3
    bound = float(np.sqrt(2.0) * np.sqrt(3.0 / fan_in))
    weight = jax.random.uniform(
        kw, (num_filter_basis, out_channels, Cin, kernel_size, kernel_size, kernel_size),
        dtype=jnp.float32, minval=-bound, maxval=bound)
    relaxed_weights = jnp.ones((num_filter_basis, group_order), dtype=jnp.float32)

    fwd = jax.jit(functools.partial(sep_relaxed_octahedral_lift_conv3d,
                                    reflection=reflection, activation=True))
    y = jax.block_until_ready(fwd(x, weight, relaxed_weights))
    assert y.shape == (B, out_channels, group_order, D, H, W)

    # Pure-JAX (XLA conv) references for the conv + view + leaky_relu path
    conv_w = build_relaxed_conv_weights(weight, relaxed_weights, reflection)
    pad = (kernel_size - 1) // 2

    def ref_conv(xr, wr):
        yr = jax.lax.conv_general_dilated(
            xr, wr, window_strides=(1, 1, 1), padding=[(pad, pad)] * 3,
            dimension_numbers=('NCDHW', 'OIDHW', 'NCDHW'))
        yr = yr.reshape(B, out_channels, group_order, D, H, W)
        return jnp.where(yr >= 0, yr, 0.01 * yr)

    # (1) tight check: same math as the kernel (inputs rounded to bf16, f32 accumulation)
    y_tight = ref_conv(x.astype(jnp.bfloat16).astype(jnp.float32),
                       conv_w.astype(jnp.bfloat16).astype(jnp.float32))
    np.testing.assert_allclose(np.asarray(y), np.asarray(y_tight), rtol=1e-3, atol=1e-3)

    # (2) loose check against full-f32 module semantics (tolerance covers bf16 rounding)
    y_f32 = ref_conv(x, conv_w)
    np.testing.assert_allclose(np.asarray(y), np.asarray(y_f32), rtol=5e-2, atol=5e-2)

    print("KERNEL_OK")
</pallas_src>

<mosaic_0001>
module attributes {stable_mosaic.version = 11 : i64} {
  func.func @_lift_conv_kernel(%arg0: i32, %arg1: i32, %arg2: memref<1x1x64x18xbf16, #tpu.memory_space<vmem>>, %arg3: memref<1x1x64x18xbf16, #tpu.memory_space<vmem>>, %arg4: memref<1x1x64x18xbf16, #tpu.memory_space<vmem>>, %arg5: memref<3x18x48xbf16, #tpu.memory_space<vmem>>, %arg6: memref<1x1x64x48xf32, #tpu.memory_space<vmem>>) attributes {dimension_semantics = [#tpu.dimension_semantics<parallel>, #tpu.dimension_semantics<parallel>], iteration_bounds = array<i64: 2, 8>, scalar_prefetch = 0 : i64, scratch_operands = 0 : i64, tpu.core_type = #tpu.core_type<tc>, window_params = [{transform_indices = @transform_0, window_bounds = array<i64: 1, 1, 64, 18>}, {transform_indices = @transform_1, window_bounds = array<i64: 1, 1, 64, 18>}, {transform_indices = @transform_2, window_bounds = array<i64: 1, 1, 64, 18>}, {pipeline_mode = #tpu.pipeline_mode<synchronous>, transform_indices = @transform_3, window_bounds = array<i64: 3, 18, 48>}, {transform_indices = @transform_4, window_bounds = array<i64: 1, 1, 64, 48>}]} {
    %c0 = arith.constant 0 : index
    %c0_0 = arith.constant 0 : index
    %c0_1 = arith.constant 0 : index
    %c0_2 = arith.constant 0 : index
    %0 = vector.load %arg2[%c0, %c0_0, %c0_1, %c0_2] : memref<1x1x64x18xbf16, #tpu.memory_space<vmem>>, vector<1x1x64x18xbf16>
    %1 = vector.shape_cast %0 : vector<1x1x64x18xbf16> to vector<64x18xbf16>
    %c0_3 = arith.constant 0 : index
    %c0_4 = arith.constant 0 : index
    %c0_5 = arith.constant 0 : index
    %2 = vector.load %arg5[%c0_3, %c0_4, %c0_5] : memref<3x18x48xbf16, #tpu.memory_space<vmem>>, vector<1x18x48xbf16>
    %3 = vector.shape_cast %2 : vector<1x18x48xbf16> to vector<18x48xbf16>
    %cst = arith.constant dense<0.000000e+00> : vector<64x48xf32>
    %4 = tpu.matmul %1, %3, %cst {dimension_numbers = #tpu.dot_dimension_numbers<[1], [0], [0], [1], [0, 0, 1, 1], [], []>} : vector<64x18xbf16>, vector<18x48xbf16>, vector<64x48xf32> -> vector<64x48xf32>
    %c0_6 = arith.constant 0 : index
    %c0_7 = arith.constant 0 : index
    %c0_8 = arith.constant 0 : index
    %c0_9 = arith.constant 0 : index
    %5 = vector.load %arg3[%c0_6, %c0_7, %c0_8, %c0_9] : memref<1x1x64x18xbf16, #tpu.memory_space<vmem>>, vector<1x1x64x18xbf16>
    %6 = vector.shape_cast %5 : vector<1x1x64x18xbf16> to vector<64x18xbf16>
    %c1 = arith.constant 1 : index
    %c0_10 = arith.constant 0 : index
    %c0_11 = arith.constant 0 : index
    %7 = vector.load %arg5[%c1, %c0_10, %c0_11] : memref<3x18x48xbf16, #tpu.memory_space<vmem>>, vector<1x18x48xbf16>
    %8 = vector.shape_cast %7 : vector<1x18x48xbf16> to vector<18x48xbf16>
    %cst_12 = arith.constant dense<0.000000e+00> : vector<64x48xf32>
    %9 = tpu.matmul %6, %8, %cst_12 {dimension_numbers = #tpu.dot_dimension_numbers<[1], [0], [0], [1], [0, 0, 1, 1], [], []>} : vector<64x18xbf16>, vector<18x48xbf16>, vector<64x48xf32> -> vector<64x48xf32>
    %10 = arith.addf %4, %9 : vector<64x48xf32>
    %c0_13 = arith.constant 0 : index
    %c0_14 = arith.constant 0 : index
    %c0_15 = arith.constant 0 : index
    %c0_16 = arith.constant 0 : index
    %11 = vector.load %arg4[%c0_13, %c0_14, %c0_15, %c0_16] : memref<1x1x64x18xbf16, #tpu.memory_space<vmem>>, vector<1x1x64x18xbf16>
    %12 = vector.shape_cast %11 : vector<1x1x64x18xbf16> to vector<64x18xbf16>
    %c2 = arith.constant 2 : index
    %c0_17 = arith.constant 0 : index
    %c0_18 = arith.constant 0 : index
    %13 = vector.load %arg5[%c2, %c0_17, %c0_18] : memref<3x18x48xbf16, #tpu.memory_space<vmem>>, vector<1x18x48xbf16>
    %14 = vector.shape_cast %13 : vector<1x18x48xbf16> to vector<18x48xbf16>
    %cst_19 = arith.constant dense<0.000000e+00> : vector<64x48xf32>
    %15 = tpu.matmul %12, %14, %cst_19 {dimension_numbers = #tpu.dot_dimension_numbers<[1], [0], [0], [1], [0, 0, 1, 1], [], []>} : vector<64x18xbf16>, vector<18x48xbf16>, vector<64x48xf32> -> vector<64x48xf32>
    %16 = arith.addf %10, %15 : vector<64x48xf32>
    %cst_20 = arith.constant 0.000000e+00 : f32
    %17 = vector.broadcast %cst_20 : f32 to vector<64x48xf32>
    %18 = arith.cmpf oge, %16, %17 : vector<64x48xf32>
    %cst_21 = arith.constant 0.00999999977 : f32
    %19 = vector.broadcast %cst_21 : f32 to vector<64x48xf32>
    %20 = arith.mulf %19, %16 : vector<64x48xf32>
    %21 = arith.select %18, %16, %20 : vector<64x48xi1>, vector<64x48xf32>
    %c0_22 = arith.constant 0 : index
    %c0_23 = arith.constant 0 : index
    %c0_24 = arith.constant 0 : index
    %c0_25 = arith.constant 0 : index
    %22 = vector.load %arg6[%c0_22, %c0_23, %c0_24, %c0_25] : memref<1x1x64x48xf32, #tpu.memory_space<vmem>>, vector<1x1x64x48xf32>
    %23 = vector.shape_cast %22 : vector<1x1x64x48xf32> to vector<64x48xf32>
    %24 = vector.shape_cast %21 : vector<64x48xf32> to vector<1x1x64x48xf32>
    tpu.vector_store %arg6[%c0_22, %c0_23, %c0_24, %c0_25], %24 {strides = array<i32>} : memref<1x1x64x48xf32, #tpu.memory_space<vmem>>, vector<1x1x64x48xf32>,
    return
  }
  func.func @transform_0(%arg0: i32, %arg1: i32) -> (i32, i32, i32, i32) {
    %c0_i32 = arith.constant 0 : i32
    %0 = arith.addi %arg1, %c0_i32 : i32
    %c0_i32_0 = arith.constant 0 : i32
    %c0_i32_1 = arith.constant 0 : i32
    %c0_i32_2 = arith.constant 0 : i32
    return %arg0, %0, %c0_i32_0, %c0_i32_1 : i32, i32, i32, i32
  }
  func.func @transform_1(%arg0: i32, %arg1: i32) -> (i32, i32, i32, i32) {
    %c1_i32 = arith.constant 1 : i32
    %0 = arith.addi %arg1, %c1_i32 : i32
    %c0_i32 = arith.constant 0 : i32
    %c0_i32_0 = arith.constant 0 : i32
    %c0_i32_1 = arith.constant 0 : i32
    return %arg0, %0, %c0_i32, %c0_i32_0 : i32, i32, i32, i32
  }
  func.func @transform_2(%arg0: i32, %arg1: i32) -> (i32, i32, i32, i32) {
    %c2_i32 = arith.constant 2 : i32
    %0 = arith.addi %arg1, %c2_i32 : i32
    %c0_i32 = arith.constant 0 : i32
    %c0_i32_0 = arith.constant 0 : i32
    %c0_i32_1 = arith.constant 0 : i32
    return %arg0, %0, %c0_i32, %c0_i32_0 : i32, i32, i32, i32
  }
  func.func @transform_3(%arg0: i32, %arg1: i32) -> (i32, i32, i32) {
    %c0_i32 = arith.constant 0 : i32
    %c0_i32_0 = arith.constant 0 : i32
    %c0_i32_1 = arith.constant 0 : i32
    %c0_i32_2 = arith.constant 0 : i32
    return %c0_i32, %c0_i32_0, %c0_i32_1 : i32, i32, i32
  }
  func.func @transform_4(%arg0: i32, %arg1: i32) -> (i32, i32, i32, i32) {
    %c0_i32 = arith.constant 0 : i32
    %c0_i32_0 = arith.constant 0 : i32
    %c0_i32_1 = arith.constant 0 : i32
    return %arg0, %arg1, %c0_i32, %c0_i32_0 : i32, i32, i32, i32
  }
}

</mosaic_0001>

<bundles_post_ra>
// kernel: sep_relaxed_octahedral_lift_conv3d.1
= control target key start
LH: loop header
LB: loop body
LE: loop exit
PB: predicated region body
PF: predicated region fallthrough
CT: control target
= control target key end

     0   :  { %s1097_s15 = smov 0   ;;  %s1099_s16 = smov 0   ;;  %s1226_s0 = inlined_call_operand.vmem [shape: bf16[2,10,64,18], index: 0, kind: input, shape index: {}, may-alias: {0,1,2}]   ;;  %s1227_s1 = inlined_call_operand.vmem [shape: bf16[2,10,64,18], index: 1, kind: input, shape index: {}, may-alias: {0,1,2}]   ;;  %s1228_s2 = inlined_call_operand.vmem [shape: bf16[2,10,64,18], index: 2, kind: input, shape index: {}, may-alias: {0,1,2}]   ;;  %s1229_s3 = inlined_call_operand.vmem [shape: bf16[3,18,48], index: 3, kind: input, shape index: {}]   ;;  %s1230_s4 = inlined_call_operand.vmem [shape: f32[2,8,64,48], index: 4, kind: output, shape index: {}]  }
   0x1   :  { %s1101_s17 = smov 0   ;;  %s1103_s18 = smov 0  }
   0x2   :  { %s1105_s19 = smov 0  }
   0x3 LB: > { %s23_s20 = sadd.s32 1, %s1062_s17  ;;  %s26_s21 = sadd.s32 1, %s1066_s18  ;;  %s1070_s19 = sphi %s1105_s19, %s14_s19   ;;  %s1066_s18 = sphi %s1103_s18, %s1234_s18   ;;  %s1062_s17 = sphi %s1101_s17, %s1233_s17   ;;  %s1058_s16 = sphi %s1099_s16, %s1232_s16   ;;  %s1054_s15 = sphi %s1097_s15, %s1231_s15  }
   0x4   : > { %p24_p0 = scmp.ge.s32.totalorder %s23_s20, 8  ;;  %p863_p1 = scmp.ge.s32.totalorder %s1070_s19, 1 }
   0x5   : > { %p222_p2 = scmp.lt.s32.totalorder %s1070_s19, 17 }
   0x6   : > { %s1236_s20 = smov (%p24_p0, %s23_s20), 0  ;;  %s1238_s21 = smov (!%p24_p0, %s26_s21), %s1066_s18 }
   0x7   : > { %p223_p3 = pnand %p863_p1, %p222_p2  ;;  %p28_p4 = scmp.ge.s32.totalorder %s1238_s21, 2 }
   0x8   : > { %p276_p5 = scmp.lt.s32.totalorder (!%p223_p3), %s1058_s16, 1  ;;  %s285_s26 = sadd.s32 (!%p223_p3), 1, %s1054_s15 }
   0x9   : > { %s1240_s21 = smov (%p28_p4, %s1238_s21), 0  ;;  %226 = sbr.rel (%p223_p3) target bundleno = 247 (0xf7), region = 36 }
   0xa   : > { %p288_p6 = scmp.lt.s32.totalorder (!%p223_p3), %s285_s26, 9  ;;  %s296_s6 = sadd.s32 (!%p223_p3), 2, %s1054_s15 }
   0xb   : > { %p278_p7 = scmp.lt.s32.totalorder (!%p223_p3), %s1054_s15, 9  ;;  %p299_p8 = scmp.lt.s32.totalorder (!%p223_p3), %s296_s6, 9 }
   0xc   : > { %p309_p9 = scmp.lt.s32.totalorder (!%p223_p3), %s1054_s15, 7 }
   0xe   : > { %v1014_v0 = vld [vmem:[%s1229_s3 + $0x14] ss:$0 sps:$4 sm:$0x11]   ;;  %vm382_vm0 = vcmask 1040384   ;;  %v1015_v1 = vld [vmem:[%s1229_s3 + $0xc] sm:$0xff]   ;;  %s1242_s16 = smov (!%p276_p5, %s1058_s16), 1 }
   0xf   : > { %970 = vmatprep.subr.msk.bf16.mxu1 %vm382_vm0, %v1014_v0  ;;  %969 = vmatprep.subr.msk.bf16.mxu0 %vm382_vm0, %v1014_v0  ;;  %v384_v2 = vsel %vm382_vm0, %v1014_v0, 0  ;;  %v1018_v3 = vld [vmem:[%s1229_s3 + $0x8] ss:$0 sps:$4 sm:$0x11]   ;;  %s1148_s5 = smul.u32 80, %s1242_s16  ;;  %s1244_s26 = smov (!%p288_p6, %s285_s26), 9 }
  0x10   : > { %967 = vmatpush3.bf16.msra.mxu1 %v384_v2  ;;  %930 = vmatpush3.bf16.msra.mxu0 %v384_v2  ;;  %v1021_v4 = vld [vmem:[%s1229_s3 + $0x20] ss:$0 sps:$4 sm:$0x11]   ;;  %s866_s7 = sshll.u32 %s1244_s26, 3  ;;  %vm369_vm1 = vcmask 146432   ;;  %v493_v5 = vsel %vm382_vm0, %v1018_v3, 0 }
  0x11   : > { %966 = vmatprep.subr.bf16.mxu1 %v1015_v1  ;;  %931 = vmatprep.subr.bf16.mxu0 %v1015_v1  ;;  %s292_s8 = sadd.s32 %s1148_s5, %s866_s7  ;;  %v614_v6 = vsel %vm382_vm0, %v1021_v4, 0  ;;  %v1023_v8 = vld [vmem:[%s1229_s3 + $0x18] sm:$0xff]   ;;  %v1022_v10 = vld [vmem:[%s1229_s3] sm:$0xff]   ;;  %s1246_s6 = smov (!%p299_p8, %s296_s6), 9  ;;  %vm713_vm2 = vcmask 392192  }
  0x12   : > { %s867_s9 = sshll.u32 %s292_s8, 2  ;;  %s868_s27 = sshll.u32 %s1246_s6, 3 }
  0x13   : > { %s294_s12 = scalar_lea.vmem %s1227_s1, %s867_s9  ;;  %s303_s29 = sadd.s32 %s1148_s5, %s868_s27 }
  0x14   : > { %968 = vmatpush3.bf16.msra.mxu1 %v1015_v1  ;;  %932 = vmatpush3.bf16.msra.mxu0 %v1015_v1  ;;  %v1016_v7 = vld [vmem:[%s294_s12] sm:$0xff]   ;;  %s279_s22 = scalar_select %p278_p7, %s1054_s15, 9  ;;  %v1017_v9 = vld [vmem:[%s294_s12 + $0x10] sm:$0xff]   ;;  %v1019_v11 = vld [vmem:[%s294_s12 + $0x8] sm:$0xff]  }
  0x15   : > { %971 = vmatprep.subr.msk.bf16.mxu1 %vm382_vm0, %v1018_v3  ;;  %972 = vmatprep.subr.msk.bf16.mxu0 %vm382_vm0, %v1021_v4  ;;  %v1020_v12 = vld [vmem:[%s294_s12 + $0x18] sm:$0xff]   ;;  %s869_s9 = sshll.u32 %s303_s29, 2  ;;  %s1248_s15 = smov (!%p309_p9, %s1054_s15), 7 }
  0x16   : > { %933 = vmatprep.mubr.msk.bf16.mxu0 %vm369_vm1, %v1016_v7  ;;  %s864_s25 = sshll.u32 %s279_s22, 3  ;;  %937 = vmatprep.mubr.msk.bf16.mxu1 %vm369_vm1, %v1017_v9  ;;  %s305_s12 = scalar_lea.vmem %s1228_s2, %s869_s9 }
  0x17   : > { %s282_s26 = sadd.s32 %s1148_s5, %s864_s25  ;;  %934 = vmatmul.mubr.msk.bf16.vlgmr.msra.gmra.mxu0 %vm369_vm1, %v1019_v11  ;;  %938 = vmatmul.mubr.msk.bf16.vlgmr.msra.gmra.mxu1 %vm369_vm1, %v1020_v12  ;;  %v1025_v14 = vld [vmem:[%s305_s12] sm:$0xff]   ;;  %v1027_v16 = vld [vmem:[%s305_s12 + $0x8] sm:$0xff]   ;;  %v1029_v18 = vld [vmem:[%s305_s12 + $0x10] sm:$0xff]   ;;  %s870_s5 = sshll.u32 %s1248_s15, 3 }
  0x18   : > { %s865_s28 = sshll.u32 %s282_s26, 2  ;;  %954 = vmatpush3.bf16.msra.mxu0 %v614_v6  ;;  %942 = vmatpush3.bf16.msra.mxu1 %v493_v5  ;;  %v1031_v19 = vld [vmem:[%s305_s12 + $0x18] sm:$0xff]   ;;  %s871_s6 = sshll.u32 %s1242_s16, 6 }
  0x19   : > { %s284_s8 = scalar_lea.vmem %s1226_s0, %s865_s28  ;;  %955 = vmatprep.subr.bf16.mxu0 %v1023_v8  ;;  %943 = vmatprep.subr.bf16.mxu1 %v1022_v10  ;;  %s313_s13 = sadd.s32 %s871_s6, %s870_s5 }
  0x1a   : > { %v1024_v13 = vld [vmem:[%s284_s8] sm:$0xff]   ;;  %v1026_v15 = vld [vmem:[%s284_s8 + $0x8] sm:$0xff]   ;;  %957 = vmatprep.mubr.msk.bf16.mxu0 %vm369_vm1, %v1025_v14  ;;  %v1028_v17 = vld [vmem:[%s284_s8 + $0x10] sm:$0xff]   ;;  %s872_s14 = sshll.u32 %s313_s13, 3 }
  0x1b   : > { %945 = vmatprep.mubr.msk.bf16.mxu1 %vm369_vm1, %v1024_v13  ;;  %v1030_v20 = vld [vmem:[%s284_s8 + $0x18] sm:$0xff]   ;;  %s1193_s24 = scalar_lea.vmem %s1230_s4, %s872_s14 }
  0x1c   : > { %956 = vmatpush3.bf16.msra.mxu0 %v1023_v8  ;;  %944 = vmatpush3.bf16.msra.mxu1 %v1022_v10 }
  0x1f   : > { %958 = vmatmul.mubr.msk.bf16.vlgmr.msra.gmra.mxu0 %vm369_vm1, %v1027_v16  ;;  %946 = vmatmul.mubr.msk.bf16.vlgmr.msra.gmra.mxu1 %vm369_vm1, %v1026_v15 }
  0x20   : > { %961 = vmatprep.mubr.msk.bf16.mxu0 %vm369_vm1, %v1029_v18  ;;  %949 = vmatprep.mubr.msk.bf16.mxu1 %vm369_vm1, %v1028_v17 }
  0x27   : > { %962 = vmatmul.mubr.msk.bf16.gmra.mxu0 %vm369_vm1, %v1031_v19  ;;  %950 = vmatmul.mubr.msk.bf16.gmra.mxu1 %vm369_vm1, %v1030_v20 }
  0xd7   : > { %v935_v21 = vpop.f32.mrf.mxu0  ;;  %v939_v22 = vpop.f32.mrf.mxu1 }
  0xd9   : > { %v420_v23 = vpop.f32.mrf.mxu0  ;;  %v436_v24 = vpop.f32.mrf.mxu1 }
  0xdb   : > { %v936_v25 = vpop.f32.mrf.mxu0  ;;  %v940_v26 = vpop.f32.mrf.mxu1 }
  0xdd   : > { %v423_v27 = vpop.f32.mrf.mxu0  ;;  %v439_v28 = vpop.f32.mrf.mxu1 }
  0xdf   : > { %v959_v29 = vpop.f32.mrf.mxu0  ;;  %v947_v30 = vpop.f32.mrf.mxu1 }
  0xe0   : > { %v538_v31 = vadd.f32 %v947_v30, %v935_v21 }
  0xe1   : > { %v650_v32 = vpop.f32.mrf.mxu0  ;;  %v529_v33 = vpop.f32.mrf.mxu1 }
  0xe2   : > { %v683_v34 = vadd.f32 %v959_v29, %v538_v31  ;;  %v530_v35 = vadd.f32 %v529_v33, %v420_v23 }
  0xe3   : > { %v960_v36 = vpop.f32.mrf.mxu0  ;;  %v948_v37 = vpop.f32.mrf.mxu1 }
  0xe4   : > { %vm691_vm3 = vcmp.ge.f32.partialorder %v683_v34, 0.0  ;;  %v699_v38 = vmul.f32 0.01, %v683_v34  ;;  %v681_v39 = vadd.f32 %v650_v32, %v530_v35  ;;  %v541_v40 = vadd.f32 %v948_v37, %v936_v25 }
  0xe5   : > { %v653_v41 = vpop.f32.mrf.mxu0  ;;  %v532_v42 = vpop.f32.mrf.mxu1 }
  0xe6   : > { %v707_v43 = vsel %vm691_vm3, %v683_v34, %v699_v38  ;;  %vm689_vm4 = vcmp.ge.f32.partialorder %v681_v39, 0.0  ;;  %v697_v44 = vmul.f32 0.01, %v681_v39  ;;  %v684_v45 = vadd.f32 %v960_v36, %v541_v40 }
  0xe7   : > { %v963_v46 = vpop.f32.mrf.mxu0  ;;  %716 = vst.msk [vmem:[%s1193_s24 + $0x10] sm:$0xff] %vm713_vm2, %v707_v43  ;;  %v533_v47 = vadd.f32 %v532_v42, %v423_v27  ;;  %v951_v48 = vpop.f32.mrf.mxu1 }
  0xe8   : > { %v705_v49 = vsel %vm689_vm4, %v681_v39, %v697_v44  ;;  %vm692_vm5 = vcmp.ge.f32.partialorder %v684_v45, 0.0  ;;  %v700_v50 = vmul.f32 0.01, %v684_v45  ;;  %v554_v51 = vadd.f32 %v951_v48, %v939_v22 }
  0xe9   : > { %v666_v52 = vpop.f32.mrf.mxu0  ;;  %714 = vst.msk [vmem:[%s1193_s24] sm:$0xff] %vm713_vm2, %v705_v49  ;;  %v682_v53 = vadd.f32 %v653_v41, %v533_v47  ;;  %v545_v54 = vpop.f32.mrf.mxu1 }
  0xea   : > { %v708_v55 = vsel %vm692_vm5, %v684_v45, %v700_v50  ;;  %v687_v56 = vadd.f32 %v963_v46, %v554_v51  ;;  %v546_v57 = vadd.f32 %v545_v54, %v436_v24 }
  0xeb   : > { %717 = vst.msk [vmem:[%s1193_s24 + $0x18] sm:$0xff] %vm713_vm2, %v708_v55  ;;  %vm690_vm6 = vcmp.ge.f32.partialorder %v682_v53, 0.0  ;;  %v698_v58 = vmul.f32 0.01, %v682_v53  ;;  %v952_v59 = vpop.f32.mrf.mxu1  ;;  %v964_v63 = vpop.f32.mrf.mxu0 }
  0xec   : > { %vm695_vm7 = vcmp.ge.f32.partialorder %v687_v56, 0.0  ;;  %v703_v60 = vmul.f32 0.01, %v687_v56  ;;  %v685_v61 = vadd.f32 %v666_v52, %v546_v57  ;;  %v557_v62 = vadd.f32 %v952_v59, %v940_v26 }
  0xed   : > { %v706_v0 = vsel %vm690_vm6, %v682_v53, %v698_v58  ;;  %v548_v1 = vpop.f32.mrf.mxu1  ;;  %v669_v8 = vpop.f32.mrf.mxu0 }
  0xee   : > { %715 = vst.msk [vmem:[%s1193_s24 + $0x8] sm:$0xff] %vm713_vm2, %v706_v0  ;;  %v711_v2 = vsel %vm695_vm7, %v687_v56, %v703_v60  ;;  %vm693_vm8 = vcmp.ge.f32.partialorder %v685_v61, 0.0  ;;  %v701_v3 = vmul.f32 0.01, %v685_v61  ;;  %v688_v4 = vadd.f32 %v964_v63, %v557_v62 }
  0xef   : > { %720 = vst.msk [vmem:[%s1193_s24 + $0x30] sm:$0xff] %vm713_vm2, %v711_v2  ;;  %v549_v5 = vadd.f32 %v548_v1, %v439_v28 }
  0xf0   : > { %v709_v6 = vsel %vm693_vm8, %v685_v61, %v701_v3  ;;  %vm696_vm9 = vcmp.ge.f32.partialorder %v688_v4, 0.0  ;;  %v704_v7 = vmul.f32 0.01, %v688_v4 }
  0xf1   : > { %718 = vst.msk [vmem:[%s1193_s24 + $0x20] sm:$0xff] %vm713_vm2, %v709_v6  ;;  %v686_v9 = vadd.f32 %v669_v8, %v549_v5 }
  0xf2   : > { %v712_v10 = vsel %vm696_vm9, %v688_v4, %v704_v7 }
  0xf3   : > { %721 = vst.msk [vmem:[%s1193_s24 + $0x38] sm:$0xff] %vm713_vm2, %v712_v10  ;;  %vm694_vm10 = vcmp.ge.f32.partialorder %v686_v9, 0.0  ;;  %v702_v11 = vmul.f32 0.01, %v686_v9 }
  0xf5   : > { %v710_v12 = vsel %vm694_vm10, %v686_v9, %v702_v11 }
  0xf6   : > { %719 = vst.msk [vmem:[%s1193_s24 + $0x28] sm:$0xff] %vm713_vm2, %v710_v12 }
  0xf7 PF: > { %s14_s19 = sadd.s32 1, %s1070_s19   ;;  %s1231_s15 = smov %s1062_s17 }
  0xf8   : > { %p11_p10 = scmp.ge.s32.totalorder %s14_s19, 18   ;;  %s1232_s16 = smov %s1066_s18 }
  0xf9   : > { %s1233_s17 = smov %s1236_s20  ;;  %s1234_s18 = smov %s1240_s21 }
  0xfa   :  { %13 = sbr.rel (!%p11_p10) target bundleno = 3 (0x3), region = 74 }

</bundles_post_ra>
